<compile_context>
chip_gen: v6e
topology: v6e:2x2x1
jax: 0.10.0
libtpu: 0.0.40
codegen_flags: <defaults>
</compile_context>

<pallas_src>
import jax
import jax.numpy as jnp
from jax.experimental import pallas as pl
from jax.experimental.pallas import tpu as pltpu

_LANES = 128  # TPU vreg lane width


def _mtl_loss_kernel(x_ref, out_ref):
    # x_ref: [2, P] f32 in VMEM; row 0 = task losses, row 1 = log_vars
    # (both zero-padded on the lane axis, which is exact for this formula).
    ls = x_ref[0:1, :]                          # [1, P]
    lv = x_ref[1:2, :]                          # [1, P]
    weighted = jnp.exp(-lv) * ls + lv           # VPU + EUP, lane-dense
    out_ref[0, 0] = jnp.sum(weighted)           # scalar -> SMEM output


def multi_task_loss(losses, log_vars):
    """losses: [num_tasks], log_vars: [num_tasks] -> scalar f32 total loss."""
    num_tasks = losses.shape[0]
    if losses.dtype != jnp.float32:
        losses = losses.astype(jnp.float32)
    if log_vars.dtype != jnp.float32:
        log_vars = log_vars.astype(jnp.float32)

    # Stack into a single [2, P] lane-dense input (P = multiple of 128).
    padded = max(_LANES, ((num_tasks + _LANES - 1) // _LANES) * _LANES)
    stacked = jnp.stack([losses, log_vars], axis=0)          # [2, T]
    x = jnp.pad(stacked, ((0, 0), (0, padded - num_tasks)))  # [2, P], exact padding

    out = pl.pallas_call(
        _mtl_loss_kernel,
        out_shape=jax.ShapeDtypeStruct((1, 1), jnp.float32),
        in_specs=[pl.BlockSpec(memory_space=pltpu.MemorySpace.VMEM)],
        out_specs=pl.BlockSpec(memory_space=pltpu.MemorySpace.SMEM),
        cost_estimate=pl.CostEstimate(
            flops=3 * num_tasks,            # mul + add per task + reduce
            transcendentals=num_tasks,      # exp per task
            bytes_accessed=2 * 4 * padded + 4,
        ),
    )(x)
    return out[0, 0]


if __name__ == "__main__":
    num_tasks = 4

    # Deterministic parameter init: module initializes log_vars to zeros.
    log_vars = jnp.zeros((num_tasks,), dtype=jnp.float32)

    # Deterministic example "task losses" (what the module receives as *args).
    key = jax.random.PRNGKey(0)
    losses = jax.random.uniform(key, (num_tasks,), dtype=jnp.float32) * 2.0

    result = multi_task_loss(losses, log_vars)
    result = jax.block_until_ready(result)

    # Pure-JAX reference check of the same semantics.
    ref = jnp.sum(jnp.exp(-log_vars) * losses + log_vars)
    assert jnp.allclose(result, ref, rtol=1e-5, atol=1e-5), (result, ref)

    print("KERNEL_OK")
</pallas_src>

<mosaic_0001>
module attributes {stable_mosaic.version = 11 : i64} {
  func.func @_mtl_loss_kernel(%arg0: memref<2x128xf32, #tpu.memory_space<vmem>>, %arg1: memref<1x1xf32, #tpu.memory_space<smem>>) attributes {dimension_semantics = [], scalar_prefetch = 0 : i64, scratch_operands = 0 : i64, tpu.core_type = #tpu.core_type<tc>} {
    %c0 = arith.constant 0 : index
    %c0_0 = arith.constant 0 : index
    %0 = vector.load %arg0[%c0, %c0_0] : memref<2x128xf32, #tpu.memory_space<vmem>>, vector<1x128xf32>
    %c1 = arith.constant 1 : index
    %c0_1 = arith.constant 0 : index
    %1 = vector.load %arg0[%c1, %c0_1] : memref<2x128xf32, #tpu.memory_space<vmem>>, vector<1x128xf32>
    %cst = arith.constant 0.000000e+00 : f32
    %2 = vector.broadcast %cst : f32 to vector<1x128xf32>
    %3 = arith.subf %2, %1 : vector<1x128xf32>
    %4 = math.exp %3 : vector<1x128xf32>
    %5 = arith.mulf %4, %0 : vector<1x128xf32>
    %6 = arith.addf %5, %1 : vector<1x128xf32>
    %7 = vector.shape_cast %6 : vector<1x128xf32> to vector<1x1x128xf32>
    %cst_2 = arith.constant dense<0.000000e+00> : vector<1xf32>
    %8 = vector.multi_reduction <add>, %7, %cst_2 [1, 2] : vector<1x1x128xf32> to vector<1xf32>
    %9 = vector.shape_cast %8 : vector<1xf32> to vector<1x1x1xf32>
    %10 = vector.extract %9[0, 0, 0] : f32 from vector<1x1x1xf32>
    %c0_3 = arith.constant 0 : index
    %c0_4 = arith.constant 0 : index
    %11 = memref.load %arg1[%c0_3, %c0_4] : memref<1x1xf32, #tpu.memory_space<smem>>
    memref.store %10, %arg1[%c0_3, %c0_4] : memref<1x1xf32, #tpu.memory_space<smem>>
    return
  }
}

</mosaic_0001>

<bundles_post_ra>
// kernel: tpu_custom_call.1
= control target key start
LH: loop header
LB: loop body
LE: loop exit
PB: predicated region body
PF: predicated region fallthrough
CT: control target
= control target key end

     0   :  { %6 = vsyncpa [#allocation3], 0  ;;  %s111_s0 = inlined_call_operand.hbm [shape: f32[2,128], index: 0, kind: input, shape index: {}]   ;;  %s112_s1 = inlined_call_operand.hbm [shape: f32[1,1], index: 1, kind: output, shape index: {}]  }
   0x1   :  { %7 = vsyncpa [#allocation4], 0  ;;  %s93_s6 = smov [#allocation2]  }
   0x2   :  { %s14_s7 = sshll.u32 %s93_s6, 4  ;;  %s15_s7 = int_to_ptr.vmem [resolvable:$true] %s14_s7 }
   0x3   :  { %s69_s8 = scalar_lea.vmem %s15_s7, 32  ;;  %p74_p1 = scmp.lt.s32.totalorder %s15_s7, %s15_s7 }
   0x4   :  { %p70_p0 = scmp.ne.s32.totalorder %s15_s7, %s69_s8  ;;  %p75_p2 = scmp.lt.s32.totalorder %s69_s8, %s69_s8 }
   0x6   :  { %p76_p3 = por %p75_p2, %p74_p1 }
   0x8   :  { %p77_p4 = pnand %p76_p3, %p70_p0 }
   0xa   :  { %80 = shalt.err (!%p77_p4)
}
   0xb   :  { %17 = dma.hbm_to_vmem [thread:$0]  %s111_s0, 32, %s15_s7, [#allocation3]  }
   0xc   :  { %89 = dma.done.wait [#allocation3], 32  }
   0xd   :  { %90 = vsyncadd [#allocation3], 4294967264  ;;  %v22_v0 = vld [vmem:[#allocation2 + $0x1] sm:$0x1]  ;;  %v21_v3 = vld [vmem:[#allocation2] sm:$0x1] }
   0xe   :  { %v23_v1 = vsub.f32 0.0, %v22_v0  ;;  %vm28_vm0 = vcmask 1040384   ;;  %s94_s11 = smov [#allocation5]  }
  0x10   :  { %v24_v2 = vmul.f32 1.442695, %v23_v1 }
  0x12   :  { %59 = vpow2.f32 %v24_v2 }
  0x1f   :  { %v60_v4 = vpop.eup %59 }
  0x20   :  { %v26_v5 = vmul.f32 %v60_v4, %v21_v3 }
  0x22   :  { %v27_v6 = vadd.f32 %v26_v5, %v22_v0 }
  0x24   :  { %v29_v7 = vsel %vm28_vm0, %v27_v6, 0.0 }
  0x25   :  { %30 = vadd.xlane.f32.xlu0 %v29_v7 }
  0xae   :  { %v31_v8 = vpop.xlane.xlu0 %30 }
  0xaf   :  { %v32_v9 = vrot.slane %v31_v8, 4 }
  0xb1   :  { %v33_v10 = vadd.f32 %v32_v9, %v31_v8 }
  0xb3   :  { %v34_v11 = vrot.slane %v33_v10, 2 }
  0xb5   :  { %v35_v12 = vadd.f32 %v34_v11, %v33_v10 }
  0xb7   :  { %v36_v13 = vrot.slane %v35_v12, 1 }
  0xb9   :  { %v37_v14 = vadd.f32 %v36_v13, %v35_v12 }
  0xbb   :  { %55 = vpush %v37_v14 }
  0xec   :  { %s56_s0 = spop %55 }
  0xed   :  { %40 = sst [smem:[#allocation5]] %s56_s0 }
  0xee   :  { %48 = dma.smem_to_hbm %s94_s11, 16, %s112_s1, [#allocation4]  }
  0xef   :  { %91 = dma.done.wait [#allocation4], 16  }
  0xf0   :  { %92 = vsyncadd [#allocation4], 4294967280 }
  0xf1   :  { %52 = sfence }
  0xf2   :  { %53 = vsyncpa [#allocation3], 1 }
  0xf3   :  { %54 = vsyncpa [#allocation4], 1 }

</bundles_post_ra>
